<compile_context>
chip_gen: v7x
topology: tpu7x:2x2x1
jax: 0.10.0
libtpu: 0.0.40
codegen_flags: <defaults>
</compile_context>

<pallas_src>
import functools

import jax
import jax.numpy as jnp
from jax.experimental import pallas as pl
from jax.experimental.pallas import tpu as pltpu


def _round_up(n, m):
    return ((n + m - 1) // m) * m


def _vmem_capacity_bytes():
    try:
        return int(pltpu.get_tpu_info().vmem_capacity_bytes)
    except Exception:
        return 64 * 1024 * 1024  # conservative fallback (v7x per-TC VMEM)


# ----------------------------------------------------------------------------
# Kernels
# ----------------------------------------------------------------------------
def _ffn_kernel_acc_out(x_ref, w1_ref, b1_ref, w2_ref, b2_ref, o_ref, *,
                        precision):
    """f32 output: accumulate the second GEMM directly into the resident o_ref."""
    j = pl.program_id(1)

    @pl.when(j == 0)
    def _():
        # Fold the second bias into the accumulator init (added exactly once).
        o_ref[...] = jnp.broadcast_to(
            b2_ref[...].astype(jnp.float32), o_ref.shape)

    h = jnp.dot(x_ref[...], w1_ref[...],
                preferred_element_type=jnp.float32, precision=precision)
    h = jnp.maximum(h + b1_ref[...].astype(jnp.float32), 0.0)
    # Dropout == identity in eval mode.
    o_ref[...] += jnp.dot(h.astype(w2_ref.dtype), w2_ref[...],
                          preferred_element_type=jnp.float32,
                          precision=precision)


def _ffn_kernel_scratch(x_ref, w1_ref, b1_ref, w2_ref, b2_ref, o_ref, acc_ref,
                        *, precision):
    """Generic output dtype: f32 VMEM scratch accumulator + final cast."""
    j = pl.program_id(1)

    @pl.when(j == 0)
    def _():
        acc_ref[...] = jnp.broadcast_to(
            b2_ref[...].astype(jnp.float32), acc_ref.shape)

    h = jnp.dot(x_ref[...], w1_ref[...],
                preferred_element_type=jnp.float32, precision=precision)
    h = jnp.maximum(h + b1_ref[...].astype(jnp.float32), 0.0)
    # Dropout == identity in eval mode.
    acc_ref[...] += jnp.dot(h.astype(w2_ref.dtype), w2_ref[...],
                            preferred_element_type=jnp.float32,
                            precision=precision)

    @pl.when(j == pl.num_programs(1) - 1)
    def _():
        o_ref[...] = acc_ref[...].astype(o_ref.dtype)


# ----------------------------------------------------------------------------
# Tile selection (VMEM-budget-driven, generation-keyed)
# ----------------------------------------------------------------------------
def _est_vmem_bytes(tm, th, d_model, hidden, x_bytes, w_bytes, out_bytes,
                    use_scratch):
    w_bufs = 2 if th == hidden else 3          # Buffered(3) when weights stream
    b = 0
    b += 2 * tm * d_model * x_bytes            # x block (double-buffered)
    b += 2 * tm * d_model * out_bytes          # out block
    if use_scratch:
        b += tm * d_model * 4                  # f32 accumulator scratch
    b += w_bufs * d_model * th * w_bytes       # W1 slice
    b += w_bufs * th * d_model * w_bytes       # W2 slice
    b += w_bufs * th * w_bytes                 # b1 slice
    b += 2 * d_model * w_bytes                 # b2
    b += tm * th * 4                           # h intermediate (f32)
    b += tm * th * w_bytes                     # h cast to weight dtype
    return b


def _choose_tiles(N, d_model, hidden, x_bytes, w_bytes, out_bytes, use_scratch,
                  tm_req, th_req, row_align, budget):
    # Hidden-tile candidates: largest first.  th == hidden makes both weight
    # block indices constant over the whole grid (full weight VMEM residency).
    if th_req is not None:
        th_list = [th_req]
    else:
        th_list = [hidden]
        if hidden % 128 == 0:
            divs = [c for c in range(hidden - 128, 0, -128) if hidden % c == 0]
            # Prefer 256-aligned tiles (v6e/v7x MXU is 256-wide), then 128.
            th_list += [c for c in divs if c % 256 == 0]
            th_list += [c for c in divs if c % 256 != 0]

    # Row-tile candidates: <= requested tm, multiples of the sublane alignment.
    tm_cap = max(row_align, _round_up(N, row_align))
    tm_hi = max(row_align, min(_round_up(tm_req, row_align), tm_cap))
    raw = [tm_hi, 1024, 768, 512, 384, 256, 192, 128, 96, 64, 32, 16, 8]
    tm_list = sorted({max(row_align, min(tm_hi, _round_up(c, row_align)))
                      for c in raw}, reverse=True)

    for th in th_list:
        for tm in tm_list:
            if _est_vmem_bytes(tm, th, d_model, hidden, x_bytes, w_bytes,
                               out_bytes, use_scratch) <= budget:
                return tm, th
    return tm_list[-1], th_list[-1]


# ----------------------------------------------------------------------------
# Wrapper
# ----------------------------------------------------------------------------
def positionwise_feed_forward(x, w1, b1, w2, b2, drop_prob=0.1, *,
                              tm=512, th=None, precision=None,
                              compute_dtype=None, vmem_limit_bytes=None):
    """Transformer FFN: Linear -> ReLU -> Dropout(eval: identity) -> Linear.

    x: (..., d_model). Weights stored (in, out).  drop_prob unused (eval mode).
    precision: explicit matmul precision; default HIGHEST for f32 operands,
      DEFAULT for sub-f32 (no silent f32 through the MXU).
    compute_dtype: optionally cast x/W1/W2 (e.g. to bf16) for the fast MXU
      path; f32 accumulation is kept either way.
    """
    *lead, d_model = x.shape
    d_in, hidden = w1.shape
    assert d_in == d_model and w2.shape == (hidden, d_model)
    assert b1.shape == (hidden,) and b2.shape == (d_model,)
    N = 1
    for s in lead:
        N *= s

    out_dtype = x.dtype
    x2d = x.reshape(N, d_model)
    if compute_dtype is not None:
        x2d = x2d.astype(compute_dtype)
        w1 = w1.astype(compute_dtype)
        w2 = w2.astype(compute_dtype)

    op_dtype = jnp.result_type(x2d.dtype, w1.dtype)
    if precision is None:
        precision = (jax.lax.Precision.HIGHEST if op_dtype == jnp.float32
                     else jax.lax.Precision.DEFAULT)

    use_scratch = out_dtype != jnp.float32

    # Generation-keyed VMEM budget (~108 MiB on v5e/v6e, ~54 MiB on v7x).
    vmem_cap = _vmem_capacity_bytes()
    if vmem_limit_bytes is None:
        vmem_limit_bytes = int(vmem_cap * 0.85)
    vmem_limit_bytes = min(int(vmem_limit_bytes), vmem_cap - 2 * 1024 * 1024)
    tile_budget = max(vmem_limit_bytes - 4 * 1024 * 1024, 4 * 1024 * 1024)

    # Dtype-aware sublane alignment for the row tile (f32: 8, bf16: 16).
    row_align = 16 if x2d.dtype == jnp.bfloat16 else 8

    # Validate a user-forced hidden tile; otherwise budget-driven auto-pick.
    th_req = None
    if th is not None and hidden % th == 0 and (th == hidden or th % 128 == 0):
        th_req = th

    x_bytes = x2d.dtype.itemsize
    w_bytes = w1.dtype.itemsize
    out_bytes = jnp.dtype(out_dtype).itemsize
    tm_eff, th_eff = _choose_tiles(N, d_model, hidden, x_bytes, w_bytes,
                                   out_bytes, use_scratch, tm, th_req,
                                   row_align, tile_budget)

    # v7x megacore: keep >= 2 row tiles so the "parallel" axis shards across
    # both TensorCores (cheap when weights are VMEM-resident).
    if (th_eff == hidden and tm_eff >= 256 and N >= 512
            and _round_up(N, tm_eff) // tm_eff < 2):
        half = _round_up((N + 1) // 2, row_align)
        tm_eff = min(tm_eff, max(256, half))

    n_pad = _round_up(N, tm_eff)
    if n_pad != N:
        x2d = jnp.pad(x2d, ((0, n_pad - N), (0, 0)))
    b1_2d = b1.reshape(1, hidden)
    b2_2d = b2.reshape(1, d_model)

    grid = (n_pad // tm_eff, hidden // th_eff)
    streamed = th_eff < hidden

    def _w_spec(shape, index_map):
        # Extra pipelining depth only when weight slices are re-streamed.
        if streamed:
            try:
                return pl.BlockSpec(shape, index_map,
                                    pipeline_mode=pl.Buffered(3))
            except Exception:
                pass
        return pl.BlockSpec(shape, index_map)

    in_specs = [
        pl.BlockSpec((tm_eff, d_model), lambda i, j: (i, 0)),   # x rows
        _w_spec((d_model, th_eff), lambda i, j: (0, j)),        # W1 slice
        pl.BlockSpec((1, th_eff), lambda i, j: (0, j)),         # b1 slice
        _w_spec((th_eff, d_model), lambda i, j: (j, 0)),        # W2 slice
        pl.BlockSpec((1, d_model), lambda i, j: (0, 0)),        # b2
    ]
    out_spec = pl.BlockSpec((tm_eff, d_model), lambda i, j: (i, 0))

    if use_scratch:
        kernel = functools.partial(_ffn_kernel_scratch, precision=precision)
        scratch = [pltpu.VMEM((tm_eff, d_model), jnp.float32)]
    else:
        kernel = functools.partial(_ffn_kernel_acc_out, precision=precision)
        scratch = []

    # Advisory cost estimate for XLA's scheduler.
    weight_bytes = (d_model * hidden + hidden * d_model + hidden) * w_bytes
    cost = pl.CostEstimate(
        flops=int(4 * n_pad * d_model * hidden),
        transcendentals=0,
        bytes_accessed=int(n_pad * d_model * (x_bytes + out_bytes)
                           + grid[0] * weight_bytes + d_model * w_bytes))

    out2d = pl.pallas_call(
        kernel,
        out_shape=jax.ShapeDtypeStruct((n_pad, d_model), out_dtype),
        grid_spec=pltpu.PrefetchScalarGridSpec(
            num_scalar_prefetch=0,
            grid=grid,
            in_specs=in_specs,
            out_specs=out_spec,
            scratch_shapes=scratch,
        ),
        compiler_params=pltpu.CompilerParams(
            dimension_semantics=("parallel", "arbitrary"),
            vmem_limit_bytes=int(vmem_limit_bytes)),
        cost_estimate=cost,
    )(x2d, w1, b1_2d, w2, b2_2d)

    if n_pad != N:
        out2d = out2d[:N]
    return out2d.reshape(*lead, d_model)


# ----------------------------------------------------------------------------
# Params / reference / demo
# ----------------------------------------------------------------------------
def init_params(key, d_model, hidden, dtype=jnp.float32):
    """Mimics nn.Linear defaults (U[-1/sqrt(fan_in), 1/sqrt(fan_in)]).

    Stored transposed relative to torch ((in, out) instead of (out, in)) so the
    kernel can compute x @ W directly."""
    k1, k2, k3, k4 = jax.random.split(key, 4)
    bound1 = 1.0 / (d_model ** 0.5)
    bound2 = 1.0 / (hidden ** 0.5)
    w1 = jax.random.uniform(k1, (d_model, hidden), dtype, -bound1, bound1)
    b1 = jax.random.uniform(k2, (hidden,), dtype, -bound1, bound1)
    w2 = jax.random.uniform(k3, (hidden, d_model), dtype, -bound2, bound2)
    b2 = jax.random.uniform(k4, (d_model,), dtype, -bound2, bound2)
    return w1, b1, w2, b2


def _reference(x, w1, b1, w2, b2):
    return jnp.maximum(x.astype(jnp.float32) @ w1.astype(jnp.float32)
                       + b1.astype(jnp.float32), 0.0) \
        @ w2.astype(jnp.float32) + b2.astype(jnp.float32)


if __name__ == "__main__":
    key = jax.random.PRNGKey(0)
    kx, kp, kx2, kx3, kp2 = jax.random.split(key, 5)
    drop_prob = 0.1

    # --- tiny f32 run (f32-output kernel variant, explicit precision) -------
    B, S, d_model, hidden = 2, 8, 16, 32
    x = jax.random.normal(kx, (B, S, d_model), jnp.float32)
    w1, b1, w2, b2 = init_params(kp, d_model, hidden)

    out = jax.block_until_ready(
        positionwise_feed_forward(x, w1, b1, w2, b2, drop_prob))
    ref = _reference(x, w1, b1, w2, b2)
    assert out.shape == (B, S, d_model)
    assert jnp.allclose(out, ref, atol=2e-2, rtol=2e-2)

    # --- padded-rows run (B*S not divisible by the row tile) ----------------
    xp = jax.random.normal(kx2, (3, 5, d_model), jnp.float32)
    outp = jax.block_until_ready(
        positionwise_feed_forward(xp, w1, b1, w2, b2, drop_prob))
    refp = _reference(xp, w1, b1, w2, b2)
    assert outp.shape == (3, 5, d_model)
    assert jnp.allclose(outp, refp, atol=2e-2, rtol=2e-2)

    # --- bf16 run (scratch-accumulator kernel variant) ----------------------
    out_bf16 = jax.block_until_ready(positionwise_feed_forward(
        x.astype(jnp.bfloat16), w1.astype(jnp.bfloat16),
        b1.astype(jnp.bfloat16), w2.astype(jnp.bfloat16),
        b2.astype(jnp.bfloat16), drop_prob))
    assert out_bf16.shape == (B, S, d_model)
    assert out_bf16.dtype == jnp.bfloat16
    assert jnp.allclose(out_bf16.astype(jnp.float32), ref, atol=1e-1, rtol=5e-2)

    # --- forced hidden tiling (exercises the j-accumulation / streamed path) -
    d2, h2 = 128, 256
    x3 = jax.random.normal(kx3, (2, 8, d2), jnp.float32)
    w1b, b1b, w2b, b2b = init_params(kp2, d2, h2)
    out3 = jax.block_until_ready(
        positionwise_feed_forward(x3, w1b, b1b, w2b, b2b, drop_prob, th=128))
    ref3 = _reference(x3, w1b, b1b, w2b, b2b)
    assert out3.shape == (2, 8, d2)
    assert jnp.allclose(out3, ref3, atol=2e-2, rtol=2e-2)

    print("KERNEL_OK")
</pallas_src>

<mosaic_0001>
module attributes {stable_mosaic.version = 11 : i64} {
  func.func @_ffn_kernel_acc_out(%arg0: i32, %arg1: i32, %arg2: memref<16x16xf32, #tpu.memory_space<vmem>>, %arg3: memref<16x32xf32, #tpu.memory_space<vmem>>, %arg4: memref<1x32xf32, #tpu.memory_space<vmem>>, %arg5: memref<32x16xf32, #tpu.memory_space<vmem>>, %arg6: memref<1x16xf32, #tpu.memory_space<vmem>>, %arg7: memref<16x16xf32, #tpu.memory_space<vmem>>) attributes {dimension_semantics = [#tpu.dimension_semantics<parallel>, #tpu.dimension_semantics<arbitrary>], iteration_bounds = array<i64: 1, 1>, scalar_prefetch = 0 : i64, scratch_operands = 0 : i64, tpu.core_type = #tpu.core_type<tc>, window_params = [{transform_indices = @transform_0, window_bounds = array<i64: 16, 16>}, {transform_indices = @transform_1, window_bounds = array<i64: 16, 32>}, {transform_indices = @transform_2, window_bounds = array<i64: 1, 32>}, {transform_indices = @transform_3, window_bounds = array<i64: 32, 16>}, {pipeline_mode = #tpu.pipeline_mode<synchronous>, transform_indices = @transform_4, window_bounds = array<i64: 1, 16>}, {transform_indices = @transform_5, window_bounds = array<i64: 16, 16>}]} {
    %c0_i32 = arith.constant 0 : i32
    %0 = arith.cmpi eq, %arg1, %c0_i32 : i32
    %1 = arith.extui %0 : i1 to i32
    %c0_i32_0 = arith.constant 0 : i32
    %2 = arith.cmpi ne, %1, %c0_i32_0 : i32
    scf.if %2 {
      %c0_14 = arith.constant 0 : index
      %c0_15 = arith.constant 0 : index
      %16 = vector.load %arg6[%c0_14, %c0_15] : memref<1x16xf32, #tpu.memory_space<vmem>>, vector<1x16xf32>
      %17 = vector.shape_cast %16 : vector<1x16xf32> to vector<1x16xf32>
      %18 = vector.broadcast %17 : vector<1x16xf32> to vector<16x16xf32>
      %c0_16 = arith.constant 0 : index
      %c0_17 = arith.constant 0 : index
      %19 = vector.load %arg7[%c0_16, %c0_17] : memref<16x16xf32, #tpu.memory_space<vmem>>, vector<16x16xf32>
      tpu.vector_store %arg7[%c0_16, %c0_17], %18 {strides = array<i32>} : memref<16x16xf32, #tpu.memory_space<vmem>>, vector<16x16xf32>,
    } else {
    }
    %c0 = arith.constant 0 : index
    %c0_1 = arith.constant 0 : index
    %3 = vector.load %arg2[%c0, %c0_1] : memref<16x16xf32, #tpu.memory_space<vmem>>, vector<16x16xf32>
    %c0_2 = arith.constant 0 : index
    %c0_3 = arith.constant 0 : index
    %4 = vector.load %arg3[%c0_2, %c0_3] : memref<16x32xf32, #tpu.memory_space<vmem>>, vector<16x32xf32>
    %cst = arith.constant dense<0.000000e+00> : vector<16x32xf32>
    %5 = tpu.matmul %3, %4, %cst {dimension_numbers = #tpu.dot_dimension_numbers<[1], [0], [0], [1], [0, 0, 1, 1], [], []>, precision = #tpu.contract_precision<fp32>} : vector<16x16xf32>, vector<16x32xf32>, vector<16x32xf32> -> vector<16x32xf32>
    %c0_4 = arith.constant 0 : index
    %c0_5 = arith.constant 0 : index
    %6 = vector.load %arg4[%c0_4, %c0_5] : memref<1x32xf32, #tpu.memory_space<vmem>>, vector<1x32xf32>
    %7 = vector.broadcast %6 : vector<1x32xf32> to vector<16x32xf32>
    %8 = arith.addf %5, %7 : vector<16x32xf32>
    %cst_6 = arith.constant 0.000000e+00 : f32
    %9 = vector.broadcast %cst_6 : f32 to vector<16x32xf32>
    %10 = arith.maximumf %8, %9 : vector<16x32xf32>
    %c0_7 = arith.constant 0 : index
    %c0_8 = arith.constant 0 : index
    %11 = vector.load %arg7[%c0_7, %c0_8] : memref<16x16xf32, #tpu.memory_space<vmem>>, vector<16x16xf32>
    %c0_9 = arith.constant 0 : index
    %c0_10 = arith.constant 0 : index
    %12 = vector.load %arg5[%c0_9, %c0_10] : memref<32x16xf32, #tpu.memory_space<vmem>>, vector<32x16xf32>
    %cst_11 = arith.constant dense<0.000000e+00> : vector<16x16xf32>
    %13 = tpu.matmul %10, %12, %cst_11 {dimension_numbers = #tpu.dot_dimension_numbers<[1], [0], [0], [1], [0, 0, 1, 1], [], []>, precision = #tpu.contract_precision<fp32>} : vector<16x32xf32>, vector<32x16xf32>, vector<16x16xf32> -> vector<16x16xf32>
    %14 = arith.addf %11, %13 : vector<16x16xf32>
    %c0_12 = arith.constant 0 : index
    %c0_13 = arith.constant 0 : index
    %15 = vector.load %arg7[%c0_12, %c0_13] : memref<16x16xf32, #tpu.memory_space<vmem>>, vector<16x16xf32>
    tpu.vector_store %arg7[%c0_12, %c0_13], %14 {strides = array<i32>} : memref<16x16xf32, #tpu.memory_space<vmem>>, vector<16x16xf32>,
    return
  }
  func.func @transform_0(%arg0: i32, %arg1: i32) -> (i32, i32) {
    %c0_i32 = arith.constant 0 : i32
    %c0_i32_0 = arith.constant 0 : i32
    return %arg0, %c0_i32 : i32, i32
  }
  func.func @transform_1(%arg0: i32, %arg1: i32) -> (i32, i32) {
    %c0_i32 = arith.constant 0 : i32
    %c0_i32_0 = arith.constant 0 : i32
    return %c0_i32, %arg1 : i32, i32
  }
  func.func @transform_2(%arg0: i32, %arg1: i32) -> (i32, i32) {
    %c0_i32 = arith.constant 0 : i32
    %c0_i32_0 = arith.constant 0 : i32
    return %c0_i32, %arg1 : i32, i32
  }
  func.func @transform_3(%arg0: i32, %arg1: i32) -> (i32, i32) {
    %c0_i32 = arith.constant 0 : i32
    %c0_i32_0 = arith.constant 0 : i32
    return %arg1, %c0_i32 : i32, i32
  }
  func.func @transform_4(%arg0: i32, %arg1: i32) -> (i32, i32) {
    %c0_i32 = arith.constant 0 : i32
    %c0_i32_0 = arith.constant 0 : i32
    %c0_i32_1 = arith.constant 0 : i32
    return %c0_i32, %c0_i32_0 : i32, i32
  }
  func.func @transform_5(%arg0: i32, %arg1: i32) -> (i32, i32) {
    %c0_i32 = arith.constant 0 : i32
    %c0_i32_0 = arith.constant 0 : i32
    return %arg0, %c0_i32 : i32, i32
  }
}

</mosaic_0001>

<bundles_post_ra>
// kernel: tpu_custom_call.1
= control target key start
LH: loop header
LB: loop body
LE: loop exit
PB: predicated region body
PF: predicated region fallthrough
CT: control target
= control target key end

     0   :  { %vm32_vm0 = vcmask 130048   ;;  %s1490_s0 = inlined_call_operand.vmem [shape: f32[16,16], index: 0, kind: input, shape index: {}]   ;;  %s1491_s1 = inlined_call_operand.vmem [shape: f32[16,32], index: 1, kind: input, shape index: {}]   ;;  %s1492_s2 = inlined_call_operand.vmem [shape: f32[1,32], index: 2, kind: input, shape index: {}]   ;;  %s1493_s3 = inlined_call_operand.vmem [shape: f32[32,16], index: 3, kind: input, shape index: {}]   ;;  %s1494_s4 = inlined_call_operand.vmem [shape: f32[1,16], index: 4, kind: input, shape index: {}]   ;;  %s1495_s5 = inlined_call_operand.hbm [shape: f32[16,16], index: 5, kind: output, shape index: {}]  }
   0x1   :  { %v37_v0 = vld [vmem:[%s1491_s1] sm:$0xff]  ;;  %v38_v1 = vld [vmem:[%s1491_s1 + $0x8] sm:$0xff] }
   0x2   :  { %v35_v2 = vld [vmem:[%s1490_s0] sm:$0xff]  ;;  %v54_v3 = vand.u32 4294901760, %v37_v0  ;;  %v57_v4 = vand.u32 4294901760, %v38_v1  ;;  %v36_v6 = vld [vmem:[%s1490_s0 + $0x8] sm:$0xff] }
   0x3   :  { %v48_v5 = vsel %vm32_vm0, %v35_v2, 0  ;;  %v51_v8 = vsel %vm32_vm0, %v36_v6, 0 }
   0x4   :  { %v120_v7 = vand.u32 4294901760, %v48_v5 }
   0x5   :  { %10 = vsyncpa [#allocation3], 0  ;;  %v1288_v9 = vpack.c.bf16 %v57_v4, %v54_v3  ;;  %v130_v10 = vand.u32 4294901760, %v51_v8  ;;  %v142_v11 = vsub.f32 %v37_v0, %v54_v3  ;;  %v149_v12 = vsub.f32 %v38_v1, %v57_v4  ;;  %v559_v30 = vld [vmem:[%s1493_s3] sm:$0xff]  ;;  %v560_v31 = vld [vmem:[%s1493_s3 + $0x8] sm:$0xff]  ;;  %s1409_s9 = smov [#allocation2]  }
   0x6   :  { %v121_v13 = vsub.f32 %v48_v5, %v120_v7  ;;  %v571_v32 = vand.u32 4294901760, %v559_v30  ;;  %v574_v33 = vand.u32 4294901760, %v560_v31  ;;  %v561_v36 = vld [vmem:[%s1493_s3 + $0x10] sm:$0xff]  ;;  %v562_v37 = vld [vmem:[%s1493_s3 + $0x18] sm:$0xff]  ;;  %v1119_v62 = vld [vmem:[%s1492_s2] ss:$0 sm:$0xff] }
   0x7   :  { %1289 = vmatprep.subr.bf16.mxu0 %v1288_v9  ;;  %v131_v14 = vsub.f32 %v51_v8, %v130_v10  ;;  %v143_v15 = vand.u32 4294901760, %v142_v11  ;;  %v150_v16 = vand.u32 4294901760, %v149_v12  ;;  %v1296_v28 = vpack.c.bf16 %v149_v12, %v142_v11  ;;  %s1107_s10 = sshll.u32 %s1409_s9, 4  ;;  %s1108_s10 = int_to_ptr.vmem [resolvable:$true] %s1107_s10 }
   0x8   :  { %1291 = vmatpush3.bf16.msra.mxu0 %v1288_v9  ;;  %v122_v17 = vand.u32 4294901760, %v121_v13  ;;  %v661_v34 = vsub.f32 %v559_v30, %v571_v32  ;;  %v668_v35 = vsub.f32 %v560_v31, %v574_v33  ;;  %v577_v40 = vand.u32 4294901760, %v561_v36  ;;  %p1390_p1 = scmp.lt.s32.totalorder %s1108_s10, %s1108_s10 }
   0x9   :  { %v132_v18 = vand.u32 4294901760, %v131_v14  ;;  %v144_v19 = vsub.f32 %v142_v11, %v143_v15  ;;  %v151_v20 = vsub.f32 %v149_v12, %v150_v16  ;;  %v1304_v29 = vpack.c.bf16 %v150_v16, %v143_v15 }
   0xa   :  { %v123_v21 = vsub.f32 %v121_v13, %v122_v17  ;;  %v662_v38 = vand.u32 4294901760, %v661_v34  ;;  %v669_v39 = vand.u32 4294901760, %v668_v35  ;;  %v580_v41 = vand.u32 4294901760, %v562_v37 }
   0xb   :  { %v133_v22 = vsub.f32 %v131_v14, %v132_v18  ;;  %v145_v23 = vand.u32 4294901760, %v144_v19  ;;  %v152_v24 = vand.u32 4294901760, %v151_v20  ;;  %v675_v44 = vsub.f32 %v561_v36, %v577_v40 }
   0xc   :  { %v124_v25 = vand.u32 4294901760, %v123_v21  ;;  %v663_v42 = vsub.f32 %v661_v34, %v662_v38  ;;  %v670_v43 = vsub.f32 %v668_v35, %v669_v39  ;;  %v682_v45 = vsub.f32 %v562_v37, %v580_v41 }
   0xd   :  { %v134_v26 = vand.u32 4294901760, %v133_v22  ;;  %v1292_v27 = vpack.c.bf16 %v152_v24, %v145_v23  ;;  %v676_v48 = vand.u32 4294901760, %v675_v44  ;;  %v1312_v56 = vpack.c.bf16 %v574_v33, %v571_v32 }
   0xe   :  { %1184 = vmatprep.mubr.f32.mxu0 %v124_v25  ;;  %v664_v46 = vand.u32 4294901760, %v663_v42  ;;  %v671_v47 = vand.u32 4294901760, %v670_v43  ;;  %v683_v49 = vand.u32 4294901760, %v682_v45  ;;  %v1328_v57 = vpack.c.bf16 %v668_v35, %v661_v34 }
   0xf   :  { %1185 = vmatmul.mubr.f32.vlgmr.msra.gmra.mrb[0].mxu0 %v134_v26  ;;  %1293 = vmatprep.subr.bf16.mxu0 %v1292_v27  ;;  %v677_v51 = vsub.f32 %v675_v44, %v676_v48  ;;  %v1316_v58 = vpack.c.bf16 %v580_v41, %v577_v40  ;;  %v1332_v59 = vpack.c.bf16 %v682_v45, %v675_v44  ;;  %vm563_vm1 = vcmask 261120  }
  0x10   :  { %1295 = vmatpush3.bf16.msra.mxu0 %v1292_v27  ;;  %1191 = vmatprep.mubr.f32.mxu0 %v120_v7  ;;  %v1320_v50 = vpack.c.bf16 %v671_v47, %v664_v46  ;;  %v684_v52 = vsub.f32 %v682_v45, %v683_v49  ;;  %v1344_v60 = vpack.c.bf16 %v669_v39, %v662_v38 }
  0x11   :  { %1297 = vmatprep.subr.bf16.mxu0 %v1296_v28  ;;  %v678_v53 = vand.u32 4294901760, %v677_v51  ;;  %v1348_v61 = vpack.c.bf16 %v683_v49, %v676_v48 }
  0x12   :  { %1321 = vmatprep.subr.bf16.mxu1 %v1320_v50  ;;  %v685_v54 = vand.u32 4294901760, %v684_v52 }
  0x13   :  { %1323 = vmatpush3.bf16.msra.mxu1 %v1320_v50 }
  0x14   :  { %v1324_v55 = vpack.c.bf16 %v685_v54, %v678_v53 }
  0x16   :  { %1325 = vmatprep.subr.bf16.mxu1 %v1324_v55 }
  0x17   :  { %1192 = vmatmul.mubr.f32.vlgmr.msra.gmra.mrb[0].mxu0 %v130_v10  ;;  %1327 = vmatpush3.bf16.msra.mxu1 %v1324_v55 }
  0x18   :  { %1299 = vmatpush3.bf16.msra.mxu0 %v1296_v28  ;;  %1198 = vmatprep.mubr.f32.mxu0 %v121_v13 }
  0x19   :  { %1301 = vmatprep.subr.bf16.mxu0 %v1288_v9  ;;  %1329 = vmatprep.subr.bf16.mxu1 %v1328_v57 }
  0x1f   :  { %1199 = vmatmul.mubr.f32.vlgmr.msra.gmra.mrb[0].mxu0 %v131_v14 }
  0x20   :  { %1303 = vmatpush3.bf16.msra.mxu0 %v1288_v9  ;;  %1205 = vmatprep.mubr.f32.mxu0 %v122_v17  ;;  %v1118_v17 = vld [vmem:[%s1494_s4] ss:$0 sm:$0xff]  ;;  %s1385_s4 = scalar_lea.vmem %s1108_s10, 256 }
  0x21   :  { %1305 = vmatprep.subr.bf16.mxu0 %v1304_v29  ;;  %34 = vst.msk [vmem:[#allocation2 + $0x8] sm:$0xff] %vm32_vm0, %v1118_v17  ;;  %33 = vst.msk [vmem:[#allocation2] sm:$0xff] %vm32_vm0, %v1118_v17  ;;  %p1386_p0 = scmp.ne.s32.totalorder %s1108_s10, %s1385_s4  ;;  %p1391_p2 = scmp.lt.s32.totalorder %s1385_s4, %s1385_s4 }
  0x23   :  { %p1392_p3 = por %p1391_p2, %p1390_p1 }
  0x25   :  { %p1393_p4 = pnand %p1392_p3, %p1386_p0 }
  0x27   :  { %1206 = vmatmul.mubr.f32.vlgmr.msra.gmra.mrb[0].mxu0 %v132_v18 }
  0x28   :  { %1307 = vmatpush3.bf16.msra.mxu0 %v1304_v29  ;;  %1212 = vmatprep.mubr.f32.mxu0 %v120_v7  ;;  %v558_v20 = vld [vmem:[#allocation2 + $0x8] sm:$0xff]  ;;  %v557_v23 = vld [vmem:[#allocation2] sm:$0xff] }
  0x29   :  { %1309 = vmatprep.subr.bf16.mxu0 %v1288_v9 }
  0x2f   :  { %1213 = vmatmul.mubr.f32.vlgmr.msra.gmra.mrb[0].mxu0 %v130_v10 }
  0x30   :  { %1311 = vmatpush3.bf16.msra.mxu0 %v1288_v9  ;;  %1219 = vmatprep.mubr.f32.mxu0 %v120_v7 }
  0x31   :  { %1313 = vmatprep.subr.bf16.mxu0 %v1312_v56 }
  0x37   :  { %1220 = vmatmul.mubr.f32.vlgmr.msra.gmra.mrb[0].mxu0 %v130_v10 }
  0x38   :  { %1315 = vmatpush3.bf16.msra.mxu0 %v1312_v56 }
  0x39   :  { %1317 = vmatprep.subr.bf16.mxu0 %v1316_v58 }
  0x3c   :  { %1319 = vmatpush3.bf16.msra.mxu0 %v1316_v58 }
 0x10a   :  { %v1221_v63 = vpop.f32.mrb[0].mxu0 }
 0x10b   :  { %v1360_v0 = vadd.f32 %v1221_v63, %v1119_v62  ;;  %v545_v1 = vpop.f32.mrb[1].mxu0 }
 0x10c   :  { %v1361_v2 = vadd.f32 %v1119_v62, %v545_v1 }
 0x10d   :  { %v556_v3 = vmax.f32 %v1360_v0, 0.0 }
 0x10e   :  { %v555_v4 = vmax.f32 %v1361_v2, 0.0 }
 0x10f   :  { %v568_v5 = vsel %vm563_vm1, %v556_v3, 0 }
 0x110   :  { %v649_v6 = vand.u32 4294901760, %v568_v5  ;;  %v565_v7 = vsel %vm563_vm1, %v555_v4, 0 }
 0x111   :  { %v639_v8 = vand.u32 4294901760, %v565_v7 }
 0x112   :  { %v650_v9 = vsub.f32 %v568_v5, %v649_v6 }
 0x113   :  { %1241 = vmatprep.mubr.f32.mxu1 %v639_v8  ;;  %v640_v10 = vsub.f32 %v565_v7, %v639_v8 }
 0x114   :  { %v651_v11 = vand.u32 4294901760, %v650_v9  ;;  %1242 = vmatmul.mubr.f32.vlgmr.msra.gmra.mrb[0].mxu1 %v649_v6 }
 0x115   :  { %1331 = vmatpush3.bf16.msra.mxu1 %v1328_v57  ;;  %1252 = vmatprep.mubr.f32.mxu1 %v640_v10  ;;  %v641_v12 = vand.u32 4294901760, %v640_v10 }
 0x116   :  { %1333 = vmatprep.subr.bf16.mxu1 %v1332_v59  ;;  %v652_v13 = vsub.f32 %v650_v9, %v651_v11 }
 0x117   :  { %v642_v14 = vsub.f32 %v640_v10, %v641_v12 }
 0x118   :  { %v653_v16 = vand.u32 4294901760, %v652_v13 }
 0x119   :  { %1335 = vmatpush3.bf16.msra.mxu1 %v1332_v59  ;;  %v643_v15 = vand.u32 4294901760, %v642_v14 }
 0x11a   :  { %1337 = vmatprep.subr.bf16.mxu1 %v1312_v56 }
 0x11b   :  { %1230 = vmatprep.mubr.f32.mxu0 %v643_v15 }
 0x11c   :  { %1231 = vmatmul.mubr.f32.vlgmr.msra.gmra.mrb[2].mxu0 %v653_v16  ;;  %1253 = vmatmul.mubr.f32.vlgmr.msra.gmra.mrb[0].mxu1 %v650_v9 }
 0x11d   :  { %1339 = vmatpush3.bf16.msra.mxu1 %v1312_v56  ;;  %1263 = vmatprep.mubr.f32.mxu1 %v641_v12 }
 0x11e   :  { %1341 = vmatprep.subr.bf16.mxu1 %v1316_v58 }
 0x121   :  { %1343 = vmatpush3.bf16.msra.mxu1 %v1316_v58 }
 0x122   :  { %1345 = vmatprep.subr.bf16.mxu1 %v1344_v60 }
 0x124   :  { %1264 = vmatmul.mubr.f32.vlgmr.msra.gmra.mrb[0].mxu1 %v651_v11 }
 0x125   :  { %1347 = vmatpush3.bf16.msra.mxu1 %v1344_v60  ;;  %1274 = vmatprep.mubr.f32.mxu1 %v639_v8 }
 0x126   :  { %1349 = vmatprep.subr.bf16.mxu1 %v1348_v61 }
 0x129   :  { %1351 = vmatpush3.bf16.msra.mxu1 %v1348_v61 }
 0x12a   :  { %1353 = vmatprep.subr.bf16.mxu1 %v1312_v56 }
 0x12c   :  { %1275 = vmatmul.mubr.f32.vlgmr.msra.gmra.mrb[0].mxu1 %v649_v6 }
 0x12d   :  { %1355 = vmatpush3.bf16.msra.mxu1 %v1312_v56  ;;  %1285 = vmatprep.mubr.f32.mxu1 %v639_v8 }
 0x12e   :  { %1357 = vmatprep.subr.bf16.mxu1 %v1316_v58 }
 0x131   :  { %1359 = vmatpush3.bf16.msra.mxu1 %v1316_v58 }
 0x134   :  { %1286 = vmatmul.mubr.f32.vlgmr.msra.gmra.mrb[0].mxu1 %v649_v6 }
 0x1ef   :  { %v1232_v18 = vpop.f32.mrb[2].mxu0 }
 0x1f0   :  { %v645_v19 = vpop.f32.mrb[3].mxu0 }
 0x207   :  { %v1287_v21 = vpop.f32.mrb[0].mxu1 }
 0x208   :  { %v1362_v22 = vadd.f32 %v1287_v21, %v1232_v18  ;;  %v1088_v24 = vpop.f32.mrb[1].mxu1 }
 0x209   :  { %v1363_v25 = vadd.f32 %v1088_v24, %v645_v19 }
 0x20a   :  { %v1099_v26 = vadd.f32 %v1362_v22, %v558_v20 }
 0x20b   :  { %v1098_v27 = vadd.f32 %v1363_v25, %v557_v23 }
 0x20c   :  { %1101 = vst.msk [vmem:[#allocation2 + $0x8] sm:$0xff] %vm32_vm0, %v1099_v26 }
 0x20d   :  { %1100 = vst.msk [vmem:[#allocation2] sm:$0xff] %vm32_vm0, %v1098_v27 }
 0x20e   :  { %1396 = shalt.err (!%p1393_p4)
}
 0x20f   :  { %s1397_s13 = scalar_lea.hbm %s1495_s5, 256 }
 0x210   :  { %p1398_p5 = scmp.ne.s32.totalorder %s1495_s5, %s1397_s13  ;;  %p1401_p6 = scmp.lt.u32.totalorder %s1397_s13, %s1495_s5 }
 0x212   :  { %p1403_p7 = pnand %p1401_p6, %p1398_p5 }
 0x214   :  { %1406 = shalt.err (!%p1403_p7)
}
 0x215   :  { %s1410_s18 = smov 128   ;;  %s1411_s19 = smov 8  }
 0x216   :  { %1113 = dma.vmem_to_hbm [thread:$0]  %s1108_s10, 256, %s1495_s5, [#allocation3], %s1410_s18, %s1410_s18, %s1411_s19  }
 0x217   :  { %1407 = dma.done.wait [#allocation3], 256  }
 0x218   :  { %1408 = vsyncadd [#allocation3], 4294967040 }
 0x219   :  { %1117 = vsyncpa [#allocation3], 1 }

</bundles_post_ra>
